<compile_context>
chip_gen: v7x
topology: tpu7x:2x2x1
jax: 0.10.0
libtpu: 0.0.40
codegen_flags: <defaults>
</compile_context>

<pallas_src>
import functools

import jax
import jax.numpy as jnp
from jax.experimental import pallas as pl
from jax.experimental.pallas import tpu as pltpu


def _silu(a):
    # EUP-friendly SiLU: exp and the approximate reciprocal both ride the EUP
    # slot, leaving the VALU slots free for the depthwise FMAs.  (Approx recip
    # is fine for inference; swap in an exact divide for training paths.)
    return a * pl.reciprocal(1.0 + jnp.exp(-a), approx=True)


def _round_up(v, m):
    return -(-v // m) * m


# ----------------------------------------------------------------------------- #
#                                    kernel                                      #
# ----------------------------------------------------------------------------- #
def _dwconv_kernel(x_ref, wdw_ref, bdw_ref, wpw_ref, bpw_ref, o_ref, *,
                   ksize, stride, th, th_in, w_out, c_in, c_out, blockdiag):
    """One grid step = NB images x one H-tile of TH output rows.

    x_ref  : (NB, s*s*TH_in, W_ph*C_in)   packed, stride-phase-decomposed input
    wdw_ref: (k*k, W_out*C_in)  f32 depthwise taps, BN-folded, pre-tiled over W
    bdw_ref: (1,   W_out*C_in)  f32 depthwise bias, BN-folded, pre-tiled over W
    wpw_ref: (W_out*C_in, W_out*C_out) block-diagonal 1x1 weight   (small-C path)
             or (C_in, C_out)                                      (large-C path)
    bpw_ref: (1,   W_out*C_out) f32 1x1 bias, BN-folded, pre-tiled over W
    o_ref  : (NB, TH, W_out*C_out) lane-dense output tile (auto-pipelined)
    """
    s = stride
    nb = o_ref.shape[0]
    wc_in = w_out * c_in

    # ---- depthwise conv in the (W*C_in)-packed layout: one VPU FMA per tap ----
    # Every tap is a static (sublane, lane) slice of the packed block (the lane
    # offset could equivalently be a pltpu.roll on the XLU); the BN-folded bias
    # is fused into the first tap's accumulator init instead of a separate pass.
    acc = None
    for kh in range(ksize):
        for kw in range(ksize):
            row0 = ((kh % s) * s + (kw % s)) * th_in + kh // s
            col0 = (kw // s) * c_in
            patch = x_ref[:, pl.ds(row0, th), pl.ds(col0, wc_in)]
            tap = wdw_ref[pl.ds(kh * ksize + kw, 1), :]
            term = patch.astype(jnp.float32) * tap
            acc = term + (bdw_ref[...] if acc is None else acc)
    y = _silu(acc)                                     # (NB, TH, W_out*C_in) f32

    # ---- pointwise 1x1 conv + BN + SiLU, result directly in output packing ----
    if blockdiag:
        # Small-C path: one lane-dense matmul against a block-diagonal weight:
        # both operands are lane-dense, there is no (rows, C) lane-sparse
        # intermediate, and no relayout reshape of the f32 intermediate.
        # TODO(synk): a pure-VPU broadcast-MAC would skip the MXU entirely, but
        # regrouping C_in-packed lanes into C_out-packed lanes needs a lane
        # shuffle; folding that shuffle into the matmul weight is the cheapest
        # gather-free formulation available here.
        lhs = y.reshape(nb * th, wc_in).astype(wpw_ref.dtype)
    else:
        # Large-C path: lanes are already dense in C, use the plain channel
        # matmul (bf16 operands when the model runs bf16 for full MXU rate).
        lhs = y.reshape(nb * th * w_out, c_in).astype(wpw_ref.dtype)
    z = jnp.dot(lhs, wpw_ref[...], preferred_element_type=jnp.float32)
    z = z.reshape(nb, th, w_out * c_out)
    z = _silu(z + bpw_ref[...])
    o_ref[...] = z.astype(o_ref.dtype)


# ----------------------------------------------------------------------------- #
#                       tiling / VMEM-budget heuristics                          #
# ----------------------------------------------------------------------------- #
def _vmem_caps():
    """(per-step tile budget, compiler vmem limit) derived from the actual part.

    v7x has 64 MiB of VMEM per TensorCore, v5e/v6e 128 MiB; if the query fails we
    assume the smallest (64 MiB) so the choice is safe on every generation."""
    try:
        cap = int(pltpu.get_tpu_info().vmem_capacity_bytes)
    except Exception:
        cap = 64 << 20
    budget = cap // 4                        # 16 MiB (v7x) / 32 MiB (v5e/v6e)
    limit = min(int(cap * 0.75), 100 << 20)  # 48 MiB (v7x) / ~96 MiB (v5e/v6e)
    return budget, limit


def _step_vmem_bytes(nb, th, *, stride, ksize, w_ph, w_out, c_in, c_out,
                     in_itemsize, out_itemsize, pw_shape):
    """(8,128)-tile-padding-aware VMEM footprint of one grid step, including
    Pallas' automatic double buffering of every auto-pipelined block."""
    q = (ksize - 1) // stride
    rows_in = stride * stride * (th + q)
    in_blk = _round_up(rows_in, 8) * _round_up(w_ph * c_in, 128) * in_itemsize
    out_blk = _round_up(th, 8) * _round_up(w_out * c_out, 128) * out_itemsize
    w_blk = (_round_up(ksize * ksize, 8) * _round_up(w_out * c_in, 128)
             + _round_up(pw_shape[0], 8) * _round_up(pw_shape[1], 128)
             + 8 * _round_up(w_out * c_in, 128)
             + 8 * _round_up(w_out * c_out, 128)) * 4
    interm = _round_up(th, 8) * (_round_up(w_out * c_in, 128)
                                 + _round_up(w_out * c_out, 128)) * 4
    return nb * (2 * in_blk + 2 * out_blk + interm) + 2 * w_blk


def _pick_tiles(n, h_out, budget, fits_args):
    """Choose (NB images per step, TH output rows per step, padded H_out)."""
    def fits(nb, th):
        return _step_vmem_bytes(nb, th, **fits_args) <= budget

    if fits(1, h_out):
        # Whole image per step (the previous '>= 2 H-tiles' constraint is gone).
        # For tiny images, pack several batch elements per step to amortize the
        # ~0.35us per-grid-step overhead, keeping >= 2 grid steps so steps still
        # pipeline and shard across TensorCores.
        nb = 1
        if _step_vmem_bytes(1, h_out, **fits_args) < (1 << 19):
            for d in range(2, n + 1):
                if n % d == 0 and n // d >= 2 and fits(d, h_out):
                    nb = d
        return nb, h_out, h_out

    # Big image: tile H_out.  The output block's second-to-last dim must be a
    # multiple of 8 (or the full extent), so round H_out up to a multiple of 8
    # and slice the padding off in the wrapper (handles non-divisible H cleanly).
    h_out_p = _round_up(h_out, 8)
    th = 8
    for cand in range(16, h_out_p + 1, 8):
        if h_out_p % cand == 0 and fits(1, cand):
            th = cand
    return 1, th, h_out_p


# ----------------------------------------------------------------------------- #
#                                    wrapper                                     #
# ----------------------------------------------------------------------------- #
def _fold_bn(gamma, beta, mean, var, eps=1e-5):
    """Return (scale, bias) such that BN(x) = x * scale + bias (eval mode)."""
    inv = gamma / jnp.sqrt(var + eps)
    return inv, beta - mean * inv


def dwconv_forward(x_nchw, params, *, ksize, stride=1):
    """DWConv forward (eval-mode BatchNorm): (N,C_in,H,W) -> (N,C_out,H_out,W_out)."""
    n, c_in, h, w = x_nchw.shape
    s = stride
    pad = (ksize - 1) // 2
    h_out = (h + 2 * pad - ksize) // s + 1
    w_out = (w + 2 * pad - ksize) // s + 1
    q = (ksize - 1) // s

    # --- fold BN (eval mode, running stats) into conv weights / biases ---------
    s_dw, b_dw = _fold_bn(params["dw_bn_gamma"], params["dw_bn_beta"],
                          params["dw_bn_mean"], params["dw_bn_var"])
    s_pw, b_pw = _fold_bn(params["pw_bn_gamma"], params["pw_bn_beta"],
                          params["pw_bn_mean"], params["pw_bn_var"])
    w_dw = (params["dw_weight"] * s_dw[None, None, :]).reshape(ksize * ksize, c_in)
    w_pw = (params["pw_weight"] * s_pw[None, :]).astype(jnp.float32)
    c_out = w_pw.shape[1]

    # pre-broadcast depthwise taps / biases to the packed (W_out*C) lane layout
    wdw_t = jnp.tile(w_dw.astype(jnp.float32), (1, w_out))        # (k*k, W_out*C_in)
    bdw_t = jnp.tile(b_dw.astype(jnp.float32), w_out)[None, :]    # (1,   W_out*C_in)
    bpw_t = jnp.tile(b_pw.astype(jnp.float32), w_out)[None, :]    # (1,   W_out*C_out)

    # 1x1 conv weight: block-diagonal lane-dense form for small channel counts,
    # plain (C_in, C_out) for large ones.
    blockdiag = c_in < 128 and (w_out * c_in) * (w_out * c_out) * 4 <= (4 << 20)
    if blockdiag:
        wpw_k = jnp.kron(jnp.eye(w_out, dtype=jnp.float32), w_pw)
    else:
        wpw_k = w_pw
    if x_nchw.dtype == jnp.bfloat16:
        wpw_k = wpw_k.astype(jnp.bfloat16)   # full MXU rate for bf16 models

    # --- NCHW -> packed, stride-phase-decomposed (N, s, s, H_ph, W_ph*C_in) ----
    x = jnp.transpose(x_nchw, (0, 2, 3, 1))
    x = jnp.pad(x, ((0, 0), (pad, pad), (pad, pad), (0, 0)))
    h_ph, w_ph = h_out + q, w_out + q
    tgt_h, tgt_w = s * h_ph, s * w_ph
    x = x[:, :min(x.shape[1], tgt_h), :min(x.shape[2], tgt_w), :]
    x = jnp.pad(x, ((0, 0), (0, tgt_h - x.shape[1]), (0, tgt_w - x.shape[2]), (0, 0)))
    xp = x.reshape(n, h_ph, s, w_ph, s, c_in)
    xp = jnp.transpose(xp, (0, 2, 4, 1, 3, 5)).reshape(n, s, s, h_ph, w_ph * c_in)

    # --- pick tiles: whole image per step when it fits, else H-tiles with the
    #     halo pre-duplicated so every block is a plain auto-pipelined BlockSpec -
    budget, vmem_limit = _vmem_caps()
    fits_args = dict(stride=s, ksize=ksize, w_ph=w_ph, w_out=w_out, c_in=c_in,
                     c_out=c_out, in_itemsize=x.dtype.itemsize,
                     out_itemsize=x_nchw.dtype.itemsize, pw_shape=wpw_k.shape)
    nb, th, h_out_p = _pick_tiles(n, h_out, budget, fits_args)
    num_t = h_out_p // th
    th_in = th + q
    h_ph_p = h_out_p + q
    if h_ph_p > h_ph:
        xp = jnp.pad(xp, ((0, 0), (0, 0), (0, 0), (0, h_ph_p - h_ph), (0, 0)))
    if num_t == 1:
        xt = xp[:, None]
    else:
        xt = jnp.stack([xp[:, :, :, t * th:t * th + th_in, :]
                        for t in range(num_t)], axis=1)
    xt = xt.reshape(n, num_t, s * s * th_in, w_ph * c_in)

    kernel = functools.partial(_dwconv_kernel, ksize=ksize, stride=s, th=th,
                               th_in=th_in, w_out=w_out, c_in=c_in, c_out=c_out,
                               blockdiag=blockdiag)

    out_packed = pl.pallas_call(
        kernel,
        out_shape=jax.ShapeDtypeStruct((n, h_out_p, w_out * c_out), x_nchw.dtype),
        grid=(n // nb, num_t),
        in_specs=[
            pl.BlockSpec((nb, None, s * s * th_in, w_ph * c_in),
                         lambda b, t: (b, t, 0, 0)),
            pl.BlockSpec((ksize * ksize, w_out * c_in), lambda b, t: (0, 0)),
            pl.BlockSpec((1, w_out * c_in), lambda b, t: (0, 0)),
            pl.BlockSpec(wpw_k.shape, lambda b, t: (0, 0)),
            pl.BlockSpec((1, w_out * c_out), lambda b, t: (0, 0)),
        ],
        out_specs=pl.BlockSpec((nb, th, w_out * c_out), lambda b, t: (b, t, 0)),
        compiler_params=pltpu.CompilerParams(
            dimension_semantics=("parallel", "parallel"),
            vmem_limit_bytes=vmem_limit,
        ),
    )(xt, wdw_t, bdw_t, wpw_k, bpw_t)

    # lane-dense (N, H_out, W_out*C_out) -> NCHW, done once in the wrapper
    out = out_packed[:, :h_out].reshape(n, h_out, w_out, c_out)
    return jnp.transpose(out, (0, 3, 1, 2))


# ----------------------------------------------------------------------------- #
#                         params / reference / self-test                         #
# ----------------------------------------------------------------------------- #
def init_params(key, c_in, c_out, ksize):
    """Deterministic synthetic parameters matching the PyTorch module shapes."""
    k1, k2 = jax.random.split(key)
    # nn.Conv2d(C_in, C_in, k, groups=C_in) weight (C_in,1,k,k) -> (k, k, C_in)
    dw_weight = jax.random.normal(k1, (ksize, ksize, c_in), jnp.float32) * 0.1
    # nn.Conv2d(C_in, C_out, 1) weight (C_out, C_in, 1, 1) -> (C_in, C_out)
    pw_weight = jax.random.normal(k2, (c_in, c_out), jnp.float32) * 0.1
    return {
        "dw_weight": dw_weight,
        "dw_bn_gamma": jnp.linspace(0.8, 1.2, c_in),
        "dw_bn_beta":  jnp.linspace(-0.1, 0.1, c_in),
        "dw_bn_mean":  jnp.linspace(-0.05, 0.05, c_in),
        "dw_bn_var":   jnp.linspace(0.9, 1.1, c_in),
        "pw_weight": pw_weight,
        "pw_bn_gamma": jnp.linspace(0.9, 1.1, c_out),
        "pw_bn_beta":  jnp.linspace(-0.2, 0.2, c_out),
        "pw_bn_mean":  jnp.linspace(-0.1, 0.1, c_out),
        "pw_bn_var":   jnp.linspace(0.8, 1.2, c_out),
    }


def _reference(x_nchw, params, *, ksize, stride=1, eps=1e-5):
    """Pure-JAX reference (lax conv) for the correctness check."""
    pad = (ksize - 1) // 2
    c_in = x_nchw.shape[1]

    def silu(v):
        return v * jax.nn.sigmoid(v)

    w_dw = jnp.transpose(params["dw_weight"], (2, 0, 1))[:, None, :, :]
    y = jax.lax.conv_general_dilated(
        x_nchw, w_dw, (stride, stride), [(pad, pad), (pad, pad)],
        feature_group_count=c_in,
        dimension_numbers=("NCHW", "OIHW", "NCHW"))
    s = params["dw_bn_gamma"] / jnp.sqrt(params["dw_bn_var"] + eps)
    y = y * s[None, :, None, None] + (params["dw_bn_beta"]
                                      - params["dw_bn_mean"] * s)[None, :, None, None]
    y = silu(y)

    w_pw = jnp.transpose(params["pw_weight"], (1, 0))[:, :, None, None]
    z = jax.lax.conv_general_dilated(
        y, w_pw, (1, 1), [(0, 0), (0, 0)],
        dimension_numbers=("NCHW", "OIHW", "NCHW"))
    s = params["pw_bn_gamma"] / jnp.sqrt(params["pw_bn_var"] + eps)
    z = z * s[None, :, None, None] + (params["pw_bn_beta"]
                                      - params["pw_bn_mean"] * s)[None, :, None, None]
    return silu(z)


if __name__ == "__main__":
    N, C_IN, C_OUT, H, W, KSIZE, STRIDE = 2, 4, 8, 16, 16, 3, 1

    key = jax.random.PRNGKey(0)
    kx, kp = jax.random.split(key)
    x = jax.random.normal(kx, (N, C_IN, H, W), jnp.float32)
    params = init_params(kp, C_IN, C_OUT, KSIZE)

    out = dwconv_forward(x, params, ksize=KSIZE, stride=STRIDE)
    out = jax.block_until_ready(out)

    ref = _reference(x, params, ksize=KSIZE, stride=STRIDE)
    assert out.shape == ref.shape
    # tolerance accounts for the approximate (EUP) reciprocal used inside SiLU
    err = float(jnp.max(jnp.abs(out - ref)))
    assert err < 2e-2, f"mismatch vs reference: max abs err {err}"

    print("KERNEL_OK")
</pallas_src>

<mosaic_0001>
module attributes {stable_mosaic.version = 11 : i64} {
  func.func @_dwconv_kernel(%arg0: i32, %arg1: i32, %arg2: memref<1x1x18x72xf32, #tpu.memory_space<vmem>>, %arg3: memref<9x64xf32, #tpu.memory_space<vmem>>, %arg4: memref<1x64xf32, #tpu.memory_space<vmem>>, %arg5: memref<64x128xf32, #tpu.memory_space<vmem>>, %arg6: memref<1x128xf32, #tpu.memory_space<vmem>>, %arg7: memref<1x16x128xf32, #tpu.memory_space<vmem>>) attributes {dimension_semantics = [#tpu.dimension_semantics<parallel>, #tpu.dimension_semantics<parallel>], iteration_bounds = array<i64: 2, 1>, scalar_prefetch = 0 : i64, scratch_operands = 0 : i64, tpu.core_type = #tpu.core_type<tc>, window_params = [{transform_indices = @transform_0, window_bounds = array<i64: 1, 1, 18, 72>}, {pipeline_mode = #tpu.pipeline_mode<synchronous>, transform_indices = @transform_1, window_bounds = array<i64: 9, 64>}, {pipeline_mode = #tpu.pipeline_mode<synchronous>, transform_indices = @transform_2, window_bounds = array<i64: 1, 64>}, {pipeline_mode = #tpu.pipeline_mode<synchronous>, transform_indices = @transform_3, window_bounds = array<i64: 64, 128>}, {pipeline_mode = #tpu.pipeline_mode<synchronous>, transform_indices = @transform_4, window_bounds = array<i64: 1, 128>}, {transform_indices = @transform_5, window_bounds = array<i64: 1, 16, 128>}]} {
    %c0 = arith.constant 0 : index
    %c0_0 = arith.constant 0 : index
    %c0_1 = arith.constant 0 : index
    %c0_2 = arith.constant 0 : index
    %0 = vector.load %arg2[%c0, %c0_0, %c0_1, %c0_2] : memref<1x1x18x72xf32, #tpu.memory_space<vmem>>, vector<1x1x16x64xf32>
    %1 = vector.shape_cast %0 : vector<1x1x16x64xf32> to vector<1x16x64xf32>
    %c0_3 = arith.constant 0 : index
    %c0_4 = arith.constant 0 : index
    %2 = vector.load %arg3[%c0_3, %c0_4] : memref<9x64xf32, #tpu.memory_space<vmem>>, vector<1x64xf32>
    %3 = vector.shape_cast %2 : vector<1x64xf32> to vector<1x1x64xf32>
    %4 = vector.broadcast %3 : vector<1x1x64xf32> to vector<1x16x64xf32>
    %5 = arith.mulf %1, %4 : vector<1x16x64xf32>
    %c0_5 = arith.constant 0 : index
    %c0_6 = arith.constant 0 : index
    %6 = vector.load %arg4[%c0_5, %c0_6] : memref<1x64xf32, #tpu.memory_space<vmem>>, vector<1x64xf32>
    %7 = vector.shape_cast %6 : vector<1x64xf32> to vector<1x1x64xf32>
    %8 = vector.broadcast %7 : vector<1x1x64xf32> to vector<1x16x64xf32>
    %9 = arith.addf %5, %8 : vector<1x16x64xf32>
    %c0_7 = arith.constant 0 : index
    %c0_8 = arith.constant 0 : index
    %c0_9 = arith.constant 0 : index
    %c4 = arith.constant 4 : index
    %10 = vector.load %arg2[%c0_7, %c0_8, %c0_9, %c4] : memref<1x1x18x72xf32, #tpu.memory_space<vmem>>, vector<1x1x16x64xf32>
    %11 = vector.shape_cast %10 : vector<1x1x16x64xf32> to vector<1x16x64xf32>
    %c1 = arith.constant 1 : index
    %c0_10 = arith.constant 0 : index
    %12 = vector.load %arg3[%c1, %c0_10] : memref<9x64xf32, #tpu.memory_space<vmem>>, vector<1x64xf32>
    %13 = vector.shape_cast %12 : vector<1x64xf32> to vector<1x1x64xf32>
    %14 = vector.broadcast %13 : vector<1x1x64xf32> to vector<1x16x64xf32>
    %15 = arith.mulf %11, %14 : vector<1x16x64xf32>
    %16 = arith.addf %15, %9 : vector<1x16x64xf32>
    %c0_11 = arith.constant 0 : index
    %c0_12 = arith.constant 0 : index
    %c0_13 = arith.constant 0 : index
    %c8 = arith.constant 8 : index
    %17 = vector.load %arg2[%c0_11, %c0_12, %c0_13, %c8] : memref<1x1x18x72xf32, #tpu.memory_space<vmem>>, vector<1x1x16x64xf32>
    %18 = vector.shape_cast %17 : vector<1x1x16x64xf32> to vector<1x16x64xf32>
    %c2 = arith.constant 2 : index
    %c0_14 = arith.constant 0 : index
    %19 = vector.load %arg3[%c2, %c0_14] : memref<9x64xf32, #tpu.memory_space<vmem>>, vector<1x64xf32>
    %20 = vector.shape_cast %19 : vector<1x64xf32> to vector<1x1x64xf32>
    %21 = vector.broadcast %20 : vector<1x1x64xf32> to vector<1x16x64xf32>
    %22 = arith.mulf %18, %21 : vector<1x16x64xf32>
    %23 = arith.addf %22, %16 : vector<1x16x64xf32>
    %c0_15 = arith.constant 0 : index
    %c0_16 = arith.constant 0 : index
    %c1_17 = arith.constant 1 : index
    %c0_18 = arith.constant 0 : index
    %24 = vector.load %arg2[%c0_15, %c0_16, %c1_17, %c0_18] : memref<1x1x18x72xf32, #tpu.memory_space<vmem>>, vector<1x1x16x64xf32>
    %25 = vector.shape_cast %24 : vector<1x1x16x64xf32> to vector<1x16x64xf32>
    %c3 = arith.constant 3 : index
    %c0_19 = arith.constant 0 : index
    %26 = vector.load %arg3[%c3, %c0_19] : memref<9x64xf32, #tpu.memory_space<vmem>>, vector<1x64xf32>
    %27 = vector.shape_cast %26 : vector<1x64xf32> to vector<1x1x64xf32>
    %28 = vector.broadcast %27 : vector<1x1x64xf32> to vector<1x16x64xf32>
    %29 = arith.mulf %25, %28 : vector<1x16x64xf32>
    %30 = arith.addf %29, %23 : vector<1x16x64xf32>
    %c0_20 = arith.constant 0 : index
    %c0_21 = arith.constant 0 : index
    %c1_22 = arith.constant 1 : index
    %c4_23 = arith.constant 4 : index
    %31 = vector.load %arg2[%c0_20, %c0_21, %c1_22, %c4_23] : memref<1x1x18x72xf32, #tpu.memory_space<vmem>>, vector<1x1x16x64xf32>
    %32 = vector.shape_cast %31 : vector<1x1x16x64xf32> to vector<1x16x64xf32>
    %c4_24 = arith.constant 4 : index
    %c0_25 = arith.constant 0 : index
    %33 = vector.load %arg3[%c4_24, %c0_25] : memref<9x64xf32, #tpu.memory_space<vmem>>, vector<1x64xf32>
    %34 = vector.shape_cast %33 : vector<1x64xf32> to vector<1x1x64xf32>
    %35 = vector.broadcast %34 : vector<1x1x64xf32> to vector<1x16x64xf32>
    %36 = arith.mulf %32, %35 : vector<1x16x64xf32>
    %37 = arith.addf %36, %30 : vector<1x16x64xf32>
    %c0_26 = arith.constant 0 : index
    %c0_27 = arith.constant 0 : index
    %c1_28 = arith.constant 1 : index
    %c8_29 = arith.constant 8 : index
    %38 = vector.load %arg2[%c0_26, %c0_27, %c1_28, %c8_29] : memref<1x1x18x72xf32, #tpu.memory_space<vmem>>, vector<1x1x16x64xf32>
    %39 = vector.shape_cast %38 : vector<1x1x16x64xf32> to vector<1x16x64xf32>
    %c5 = arith.constant 5 : index
    %c0_30 = arith.constant 0 : index
    %40 = vector.load %arg3[%c5, %c0_30] : memref<9x64xf32, #tpu.memory_space<vmem>>, vector<1x64xf32>
    %41 = vector.shape_cast %40 : vector<1x64xf32> to vector<1x1x64xf32>
    %42 = vector.broadcast %41 : vector<1x1x64xf32> to vector<1x16x64xf32>
    %43 = arith.mulf %39, %42 : vector<1x16x64xf32>
    %44 = arith.addf %43, %37 : vector<1x16x64xf32>
    %c0_31 = arith.constant 0 : index
    %c0_32 = arith.constant 0 : index
    %c2_33 = arith.constant 2 : index
    %c0_34 = arith.constant 0 : index
    %45 = vector.load %arg2[%c0_31, %c0_32, %c2_33, %c0_34] : memref<1x1x18x72xf32, #tpu.memory_space<vmem>>, vector<1x1x16x64xf32>
    %46 = vector.shape_cast %45 : vector<1x1x16x64xf32> to vector<1x16x64xf32>
    %c6 = arith.constant 6 : index
    %c0_35 = arith.constant 0 : index
    %47 = vector.load %arg3[%c6, %c0_35] : memref<9x64xf32, #tpu.memory_space<vmem>>, vector<1x64xf32>
    %48 = vector.shape_cast %47 : vector<1x64xf32> to vector<1x1x64xf32>
    %49 = vector.broadcast %48 : vector<1x1x64xf32> to vector<1x16x64xf32>
    %50 = arith.mulf %46, %49 : vector<1x16x64xf32>
    %51 = arith.addf %50, %44 : vector<1x16x64xf32>
    %c0_36 = arith.constant 0 : index
    %c0_37 = arith.constant 0 : index
    %c2_38 = arith.constant 2 : index
    %c4_39 = arith.constant 4 : index
    %52 = vector.load %arg2[%c0_36, %c0_37, %c2_38, %c4_39] : memref<1x1x18x72xf32, #tpu.memory_space<vmem>>, vector<1x1x16x64xf32>
    %53 = vector.shape_cast %52 : vector<1x1x16x64xf32> to vector<1x16x64xf32>
    %c7 = arith.constant 7 : index
    %c0_40 = arith.constant 0 : index
    %54 = vector.load %arg3[%c7, %c0_40] : memref<9x64xf32, #tpu.memory_space<vmem>>, vector<1x64xf32>
    %55 = vector.shape_cast %54 : vector<1x64xf32> to vector<1x1x64xf32>
    %56 = vector.broadcast %55 : vector<1x1x64xf32> to vector<1x16x64xf32>
    %57 = arith.mulf %53, %56 : vector<1x16x64xf32>
    %58 = arith.addf %57, %51 : vector<1x16x64xf32>
    %c0_41 = arith.constant 0 : index
    %c0_42 = arith.constant 0 : index
    %c2_43 = arith.constant 2 : index
    %c8_44 = arith.constant 8 : index
    %59 = vector.load %arg2[%c0_41, %c0_42, %c2_43, %c8_44] : memref<1x1x18x72xf32, #tpu.memory_space<vmem>>, vector<1x1x16x64xf32>
    %60 = vector.shape_cast %59 : vector<1x1x16x64xf32> to vector<1x16x64xf32>
    %c8_45 = arith.constant 8 : index
    %c0_46 = arith.constant 0 : index
    %61 = vector.load %arg3[%c8_45, %c0_46] : memref<9x64xf32, #tpu.memory_space<vmem>>, vector<1x64xf32>
    %62 = vector.shape_cast %61 : vector<1x64xf32> to vector<1x1x64xf32>
    %63 = vector.broadcast %62 : vector<1x1x64xf32> to vector<1x16x64xf32>
    %64 = arith.mulf %60, %63 : vector<1x16x64xf32>
    %65 = arith.addf %64, %58 : vector<1x16x64xf32>
    %cst = arith.constant 0.000000e+00 : f32
    %66 = vector.broadcast %cst : f32 to vector<1x16x64xf32>
    %67 = arith.subf %66, %65 : vector<1x16x64xf32>
    %68 = math.exp %67 : vector<1x16x64xf32>
    %cst_47 = arith.constant 1.000000e+00 : f32
    %69 = vector.broadcast %cst_47 : f32 to vector<1x16x64xf32>
    %70 = arith.addf %69, %68 : vector<1x16x64xf32>
    %71 = tpu.reciprocal %70 {approx = true} : vector<1x16x64xf32> -> vector<1x16x64xf32>
    %72 = arith.mulf %65, %71 : vector<1x16x64xf32>
    %73 = vector.shape_cast %72 : vector<1x16x64xf32> to vector<16x64xf32>
    %c0_48 = arith.constant 0 : index
    %c0_49 = arith.constant 0 : index
    %74 = vector.load %arg5[%c0_48, %c0_49] : memref<64x128xf32, #tpu.memory_space<vmem>>, vector<64x128xf32>
    %cst_50 = arith.constant dense<0.000000e+00> : vector<16x128xf32>
    %75 = tpu.matmul %73, %74, %cst_50 {dimension_numbers = #tpu.dot_dimension_numbers<[1], [0], [0], [1], [0, 0, 1, 1], [], []>} : vector<16x64xf32>, vector<64x128xf32>, vector<16x128xf32> -> vector<16x128xf32>
    %76 = vector.shape_cast %75 : vector<16x128xf32> to vector<1x16x128xf32>
    %c0_51 = arith.constant 0 : index
    %c0_52 = arith.constant 0 : index
    %77 = vector.load %arg6[%c0_51, %c0_52] : memref<1x128xf32, #tpu.memory_space<vmem>>, vector<1x128xf32>
    %78 = vector.shape_cast %77 : vector<1x128xf32> to vector<1x1x128xf32>
    %79 = vector.broadcast %78 : vector<1x1x128xf32> to vector<1x16x128xf32>
    %80 = arith.addf %76, %79 : vector<1x16x128xf32>
    %cst_53 = arith.constant 0.000000e+00 : f32
    %81 = vector.broadcast %cst_53 : f32 to vector<1x16x128xf32>
    %82 = arith.subf %81, %80 : vector<1x16x128xf32>
    %83 = math.exp %82 : vector<1x16x128xf32>
    %cst_54 = arith.constant 1.000000e+00 : f32
    %84 = vector.broadcast %cst_54 : f32 to vector<1x16x128xf32>
    %85 = arith.addf %84, %83 : vector<1x16x128xf32>
    %86 = tpu.reciprocal %85 {approx = true} : vector<1x16x128xf32> -> vector<1x16x128xf32>
    %87 = arith.mulf %80, %86 : vector<1x16x128xf32>
    %c0_55 = arith.constant 0 : index
    %c0_56 = arith.constant 0 : index
    %c0_57 = arith.constant 0 : index
    %88 = vector.load %arg7[%c0_55, %c0_56, %c0_57] : memref<1x16x128xf32, #tpu.memory_space<vmem>>, vector<1x16x128xf32>
    tpu.vector_store %arg7[%c0_55, %c0_56, %c0_57], %87 {strides = array<i32>} : memref<1x16x128xf32, #tpu.memory_space<vmem>>, vector<1x16x128xf32>,
    return
  }
  func.func @transform_0(%arg0: i32, %arg1: i32) -> (i32, i32, i32, i32) {
    %c0_i32 = arith.constant 0 : i32
    %c0_i32_0 = arith.constant 0 : i32
    %c0_i32_1 = arith.constant 0 : i32
    return %arg0, %arg1, %c0_i32, %c0_i32_0 : i32, i32, i32, i32
  }
  func.func @transform_1(%arg0: i32, %arg1: i32) -> (i32, i32) {
    %c0_i32 = arith.constant 0 : i32
    %c0_i32_0 = arith.constant 0 : i32
    %c0_i32_1 = arith.constant 0 : i32
    return %c0_i32, %c0_i32_0 : i32, i32
  }
  func.func @transform_2(%arg0: i32, %arg1: i32) -> (i32, i32) {
    %c0_i32 = arith.constant 0 : i32
    %c0_i32_0 = arith.constant 0 : i32
    %c0_i32_1 = arith.constant 0 : i32
    return %c0_i32, %c0_i32_0 : i32, i32
  }
  func.func @transform_3(%arg0: i32, %arg1: i32) -> (i32, i32) {
    %c0_i32 = arith.constant 0 : i32
    %c0_i32_0 = arith.constant 0 : i32
    %c0_i32_1 = arith.constant 0 : i32
    return %c0_i32, %c0_i32_0 : i32, i32
  }
  func.func @transform_4(%arg0: i32, %arg1: i32) -> (i32, i32) {
    %c0_i32 = arith.constant 0 : i32
    %c0_i32_0 = arith.constant 0 : i32
    %c0_i32_1 = arith.constant 0 : i32
    return %c0_i32, %c0_i32_0 : i32, i32
  }
  func.func @transform_5(%arg0: i32, %arg1: i32) -> (i32, i32, i32) {
    %c0_i32 = arith.constant 0 : i32
    %c0_i32_0 = arith.constant 0 : i32
    return %arg0, %arg1, %c0_i32 : i32, i32, i32
  }
}

</mosaic_0001>

<bundles_post_ra>
// kernel: tpu_custom_call.1
= control target key start
LH: loop header
LB: loop body
LE: loop exit
PB: predicated region body
PF: predicated region fallthrough
CT: control target
= control target key end

     0   :  { %10 = vsyncpa [#allocation3], 0  ;;  %s1128_s0 = inlined_call_operand.vmem [shape: f32[2,1,18,72], index: 0, kind: input, shape index: {}]   ;;  %s1129_s1 = inlined_call_operand.vmem [shape: f32[9,64], index: 1, kind: input, shape index: {}]   ;;  %s1130_s2 = inlined_call_operand.vmem [shape: f32[1,64], index: 2, kind: input, shape index: {}]   ;;  %s1131_s3 = inlined_call_operand.vmem [shape: f32[64,128], index: 3, kind: input, shape index: {}]   ;;  %s1132_s4 = inlined_call_operand.vmem [shape: f32[1,128], index: 4, kind: input, shape index: {}]   ;;  %s1133_s5 = inlined_call_operand.hbm [shape: f32[2,16,128], index: 5, kind: output, shape index: {}]  }
   0x1   :  { %12 = vsyncpa [#allocation3 + $0x1], 0  ;;  %s923_s18 = smov 0   ;;  %s925_s19 = smov 0  }
   0x2   :  { %s927_s20 = smov 0   ;;  %s929_s21 = smov 0  }
   0x3   :  { %s931_s22 = smov 0   ;;  %s933_s23 = smov 0  }
   0x4 LB: > { %s661_s24 = sadd.s32 4294967295, %s886_s23   ;;  %s662_s25 = sadd.s32 4294967294, %s886_s23   ;;  %s886_s23 = sphi %s933_s23, %s18_s23   ;;  %s882_s22 = sphi %s931_s22, %s1140_s22   ;;  %s878_s21 = sphi %s929_s21, %s1139_s21   ;;  %s874_s20 = sphi %s927_s20, %s1138_s20   ;;  %s870_s19 = sphi %s925_s19, %s1137_s19   ;;  %s866_s18 = sphi %s923_s18, %s1136_s18  }
   0x5   : > { %s30_s26 = sadd.s32 1, %s882_s22  ;;  %s151_s27 = sadd.s32 1, %s874_s20 }
   0x6   : > { %p32_p0 = scmp.ge.s32.totalorder %s30_s26, 2  ;;  %p161_p1 = scmp.ne.s32.totalorder %s874_s20, %s870_s19 }
   0x7   : > { %p162_p2 = scmp.eq.s32.totalorder %s661_s24, 1  ;;  %p167_p3 = scmp.ne.s32.totalorder %s870_s19, %s866_s18 }
   0x8   : > { %s1142_s26 = smov (%p32_p0, %s30_s26), 0  ;;  %p168_p5 = scmp.eq.s32.totalorder %s662_s25, 1 }
   0x9   : > { %p963_p4 = por %p162_p2, %p161_p1  ;;  %s146_s29 = ssub.s32 %s882_s22, %s1142_s26 }
   0xa   : > { %p665_p6 = scmp.ge.s32.totalorder %s886_s23, 1  ;;  %p149_p7 = scmp.eq.s32.totalorder %s146_s29, 0 }
   0xb   : > { %p970_p8 = por %p168_p5, %p167_p3  ;;  %p210_p9 = scmp.lt.s32.totalorder %s886_s23, 3 }
   0xc   : > { %s976_s6 = scalar_select %p149_p7, %s874_s20, %s151_s27  }
   0xd   : > { %p211_p10 = pnand %p665_p6, %p210_p9 }
   0xe   : > { %v670_v0 = vld [vmem:[%s1129_s1 + $0x1] ss:$0 sm:$0xff] (!%p211_p10)  ;;  %p242_p11 = scmp.lt.s32.totalorder (!%p211_p10), %s878_s21, 1  ;;  %s888_s9 = smov (!%p211_p10), 4   ;;  %v668_v1 = vld [vmem:[%s1129_s1] ss:$0 sm:$0xff] (!%p211_p10) }
   0xf   : > { %214 = sbr.rel (%p211_p10) target bundleno = 1375 (0x55f), region = 40  ;;  %276 = vrot.lane.b32.xlu0 (!%p211_p10), %v670_v0, %s888_s9  ;;  %v669_v3 = vld [vmem:[%s1130_s2] ss:$0 sm:$0xff] (!%p211_p10)  ;;  %v671_v9 = vld [vmem:[%s1129_s1 + $0x2] ss:$0 sm:$0xff] (!%p211_p10)  ;;  %s889_s29 = smov (!%p211_p10), 8  }
  0x10   : > { %s890_s7 = smov (!%p211_p10), 120   ;;  %v673_v24 = vld [vmem:[%s1129_s1 + $0x4] ss:$0 sm:$0xff] (!%p211_p10)  ;;  %v672_v26 = vld [vmem:[%s1129_s1 + $0x3] ss:$0 sm:$0xff] (!%p211_p10)  ;;  %vm460_vm0 = vcmask (!%p211_p10), 523264  }
  0x11   : > { %v674_v34 = vld [vmem:[%s1129_s1 + $0x5] ss:$0 sm:$0xff] (!%p211_p10)  ;;  %v676_v49 = vld [vmem:[%s1129_s1 + $0x7] ss:$0 sm:$0xff] (!%p211_p10)  ;;  %v675_v51 = vld [vmem:[%s1129_s1 + $0x6] ss:$0 sm:$0xff] (!%p211_p10) }
  0x12   : > { %v677_v59 = vld [vmem:[%s1129_s1 + $0x8] ss:$0 sm:$0xff] (!%p211_p10)  ;;  %s686_s24 = sshll.u32 (!%p211_p10), %s878_s21, 8 }
  0x13   : > { %s1079_s27 = scalar_lea.hbm (!%p211_p10), %s1133_s5, %s686_s24 }
  0x16   : > { %s243_s10 = scalar_select %p242_p11, %s878_s21, 1 }
  0x17   : > { %s891_s21 = smov [#allocation2]  }
  0x18   : > { %s732_s11 = smul.u32 24, %s243_s10  ;;  %s812_s10 = sshll.u32 %s891_s21, 4  ;;  %s813_s10 = int_to_ptr.vmem [resolvable:$false] %s812_s10 }
  0x1a   : > { %s990_s16 = scalar_lea.vmem %s1128_s0, %s732_s11  ;;  %s814_s11 = scalar_lea.vmem %s813_s10, 512 }
  0x1b   : > { %v253_v2 = vld [vmem:[%s990_s16 + $0x8] sm:$0xff]  ;;  %v252_v4 = vld [vmem:[%s990_s16] sm:$0xff] }
  0x1c   : > { %v260_v5 = vmul.f32 %v668_v1, %v253_v2  ;;  %v259_v6 = vmul.f32 %v668_v1, %v252_v4  ;;  %v313_v25 = vld [vmem:[%s990_s16 + $0x9] sm:$0xff]  ;;  %v312_v27 = vld [vmem:[%s990_s16 + $0x1] sm:$0xff] }
  0x1d   : > { %v320_v28 = vmul.f32 %v672_v26, %v313_v25  ;;  %v319_v29 = vmul.f32 %v672_v26, %v312_v27  ;;  %v374_v50 = vld [vmem:[%s990_s16 + $0xa] sm:$0xff]  ;;  %v373_v52 = vld [vmem:[%s990_s16 + $0x2] sm:$0xff] }
  0x1e   : > { %v269_v7 = vadd.f32 %v669_v3, %v260_v5  ;;  %v268_v8 = vadd.f32 %v669_v3, %v259_v6  ;;  %v381_v53 = vmul.f32 %v675_v51, %v374_v50  ;;  %v380_v54 = vmul.f32 %v675_v51, %v373_v52  ;;  %v446_v3 = vld [vmem:[%s1131_s3] sm:$0xff]  ;;  %v448_v5 = vld [vmem:[%s1131_s3 + $0x10] sm:$0xff] }
  0x20   : > { %285 = vrot.lane.b32.xlu1 %v269_v7, %s888_s9  ;;  %283 = vrot.lane.b32.xlu0 %v268_v8, %s888_s9  ;;  %v449_v7 = vld [vmem:[%s1131_s3 + $0x18] sm:$0xff] }
  0x21   : > { %v720_v8 = vpack.c.bf16 %v449_v7, %v448_v5 }
  0x24   : > { %297 = vrot.lane.b32.xlu1 %v671_v9, %s889_s29  ;;  %v450_v9 = vld [vmem:[%s1131_s3 + $0x20] sm:$0xff] }
  0x81   : > { %v277_v10 = vpop.permute.xlu0 %276 }
  0x82   : > { %v279_v11 = vmul.f32 %v277_v10, %v252_v4  ;;  %v280_v12 = vmul.f32 %v277_v10, %v253_v2  ;;  %v451_v10 = vld [vmem:[%s1131_s3 + $0x28] sm:$0xff] }
  0x92   : > { %v286_v13 = vpop.permute.xlu1 %285  ;;  %v284_v14 = vpop.permute.xlu0 %283 }
  0x93   : > { %v290_v15 = vadd.f32 %v286_v13, %v280_v12  ;;  %v289_v16 = vadd.f32 %v284_v14, %v279_v11  ;;  %v724_v11 = vpack.c.bf16 %v451_v10, %v450_v9  ;;  %v452_v12 = vld [vmem:[%s1131_s3 + $0x30] sm:$0xff]  ;;  %v453_v13 = vld [vmem:[%s1131_s3 + $0x38] sm:$0xff] }
  0x94   : > { %v728_v14 = vpack.c.bf16 %v453_v13, %v452_v12 }
  0x95   : > { %306 = vrot.lane.b32.xlu1 %v290_v15, %s888_s9  ;;  %304 = vrot.lane.b32.xlu0 %v289_v16, %s888_s9 }
  0x96   : > { %v298_v17 = vpop.permute.xlu1 %297 }
  0x97   : > { %v300_v18 = vmul.f32 %v298_v17, %v252_v4  ;;  %v301_v19 = vmul.f32 %v298_v17, %v253_v2  ;;  %v447_v4 = vld [vmem:[%s1131_s3 + $0x8] sm:$0xff] }
  0x98   : > { %v716_v6 = vpack.c.bf16 %v447_v4, %v446_v3 }
  0x9a   : > { %717 = vmatprep.subr.bf16.mxu0 %v716_v6 }
  0x9b   : > { %719 = vmatpush3.bf16.msra.mxu0 %v716_v6 }
  0x9c   : > { %721 = vmatprep.subr.bf16.mxu0 %v720_v8 }
  0x9f   : > { %723 = vmatpush3.bf16.msra.mxu0 %v720_v8 }
  0xa0   : > { %725 = vmatprep.subr.bf16.mxu0 %v724_v11 }
  0xa3   : > { %727 = vmatpush3.bf16.msra.mxu0 %v724_v11 }
  0xa4   : > { %729 = vmatprep.subr.bf16.mxu0 %v728_v14 }
  0xa7   : > { %731 = vmatpush3.bf16.msra.mxu0 %v728_v14 }
 0x107   : > { %v307_v20 = vpop.permute.xlu1 %306  ;;  %v305_v21 = vpop.permute.xlu0 %304 }
 0x108   : > { %v311_v22 = vadd.f32 %v307_v20, %v301_v19  ;;  %v310_v23 = vadd.f32 %v305_v21, %v300_v18 }
 0x10a   : > { %325 = vrot.lane.b32.xlu1 %v311_v22, %s890_s7  ;;  %323 = vrot.lane.b32.xlu0 %v310_v23, %s890_s7 }
 0x10e   : > { %337 = vrot.lane.b32.xlu0 %v673_v24, %s888_s9 }
 0x17c   : > { %v326_v30 = vpop.permute.xlu1 %325  ;;  %v324_v31 = vpop.permute.xlu0 %323 }
 0x17d   : > { %v330_v32 = vadd.f32 %v326_v30, %v320_v28  ;;  %v329_v33 = vadd.f32 %v324_v31, %v319_v29 }
 0x17f   : > { %346 = vrot.lane.b32.xlu0 %v330_v32, %s888_s9  ;;  %344 = vrot.lane.b32.xlu1 %v329_v33, %s888_s9 }
 0x180   : > { %v338_v35 = vpop.permute.xlu0 %337 }
 0x181   : > { %v340_v36 = vmul.f32 %v338_v35, %v312_v27  ;;  %v341_v37 = vmul.f32 %v338_v35, %v313_v25 }
 0x183   : > { %358 = vrot.lane.b32.xlu1 %v674_v34, %s889_s29 }
 0x1f1   : > { %v345_v38 = vpop.permute.xlu1 %344  ;;  %v347_v39 = vpop.permute.xlu0 %346 }
 0x1f2   : > { %v350_v40 = vadd.f32 %v345_v38, %v340_v36  ;;  %v351_v41 = vadd.f32 %v347_v39, %v341_v37  ;;  %v680_v36 = vld [vmem:[%s1132_s4] ss:$0 sm:$0xff] }
 0x1f4   : > { %365 = vrot.lane.b32.xlu0 %v350_v40, %s888_s9  ;;  %367 = vrot.lane.b32.xlu1 %v351_v41, %s888_s9 }
 0x1f5   : > { %v359_v42 = vpop.permute.xlu1 %358 }
 0x1f6   : > { %v361_v43 = vmul.f32 %v359_v42, %v312_v27  ;;  %v362_v44 = vmul.f32 %v359_v42, %v313_v25 }
 0x266   : > { %v368_v45 = vpop.permute.xlu1 %367  ;;  %v366_v46 = vpop.permute.xlu0 %365 }
 0x267   : > { %v372_v47 = vadd.f32 %v368_v45, %v362_v44  ;;  %v371_v48 = vadd.f32 %v366_v46, %v361_v43 }
 0x269   : > { %386 = vrot.lane.b32.xlu1 %v372_v47, %s890_s7  ;;  %384 = vrot.lane.b32.xlu0 %v371_v48, %s890_s7 }
 0x26d   : > { %398 = vrot.lane.b32.xlu0 %v676_v49, %s888_s9 }
 0x2db   : > { %v387_v55 = vpop.permute.xlu1 %386  ;;  %v385_v56 = vpop.permute.xlu0 %384 }
 0x2dc   : > { %v391_v57 = vadd.f32 %v387_v55, %v381_v53  ;;  %v390_v58 = vadd.f32 %v385_v56, %v380_v54 }
 0x2de   : > { %407 = vrot.lane.b32.xlu0 %v391_v57, %s888_s9  ;;  %405 = vrot.lane.b32.xlu1 %v390_v58, %s888_s9 }
 0x2df   : > { %v399_v60 = vpop.permute.xlu0 %398 }
 0x2e0   : > { %v401_v61 = vmul.f32 %v399_v60, %v373_v52  ;;  %v402_v62 = vmul.f32 %v399_v60, %v374_v50 }
 0x2e2   : > { %419 = vrot.lane.b32.xlu1 %v677_v59, %s889_s29 }
 0x350   : > { %v406_v63 = vpop.permute.xlu1 %405  ;;  %v408_v0 = vpop.permute.xlu0 %407 }
 0x351   : > { %v411_v1 = vadd.f32 %v406_v63, %v401_v61  ;;  %v412_v2 = vadd.f32 %v408_v0, %v402_v62 }
 0x353   : > { %426 = vrot.lane.b32.xlu0 %v411_v1, %s888_s9  ;;  %428 = vrot.lane.b32.xlu1 %v412_v2, %s888_s9 }
 0x354   : > { %v420_v15 = vpop.permute.xlu1 %419 }
 0x355   : > { %v422_v16 = vmul.f32 %v420_v15, %v373_v52  ;;  %v423_v17 = vmul.f32 %v420_v15, %v374_v50 }
 0x3c5   : > { %v429_v18 = vpop.permute.xlu1 %428  ;;  %v427_v19 = vpop.permute.xlu0 %426 }
 0x3c6   : > { %v433_v20 = vadd.f32 %v429_v18, %v423_v17  ;;  %v432_v21 = vadd.f32 %v427_v19, %v422_v16 }
 0x3c8   : > { %v435_v22 = vsub.f32 0.0, %v433_v20  ;;  %v434_v23 = vsub.f32 0.0, %v432_v21 }
 0x3ca   : > { %v438_v24 = vmul.f32 1.442695, %v435_v22  ;;  %v436_v25 = vmul.f32 1.442695, %v434_v23 }
 0x3cc   : > { %792 = vpow2.f32 %v438_v24 }
 0x3cd   : > { %794 = vpow2.f32 %v436_v25 }
 0x3d6   : > { %v793_v26 = vpop.eup %792 }
 0x3d7   : > { %v795_v27 = vpop.eup %794  ;;  %v441_v28 = vadd.f32 1.0, %v793_v26 }
 0x3d8   : > { %v440_v29 = vadd.f32 1.0, %v795_v27 }
 0x3d9   : > { %796 = vrcp.f32 %v441_v28 }
 0x3da   : > { %798 = vrcp.f32 %v440_v29 }
 0x3e3   : > { %v797_v30 = vpop.eup %796 }
 0x3e4   : > { %v799_v31 = vpop.eup %798  ;;  %v445_v32 = vmul.f32 %v797_v30, %v433_v20 }
 0x3e5   : > { %v444_v33 = vmul.f32 %v799_v31, %v432_v21 }
 0x3e6   : > { %458 = vrot.lane.b32.xlu1 %v445_v32, %s890_s7 }
 0x3e7   : > { %456 = vrot.lane.b32.xlu0 %v444_v33, %s890_s7  ;;  %s239_s7 = sand.u32 1, %s870_s19  }
 0x3e8   : > { %s666_s14 = sshll.u32 %s239_s7, 4  ;;  %s1081_s8 = scalar_lea.sflag [#allocation3], %s239_s7 }
 0x3e9   : > { %s241_s15 = scalar_lea.vmem [#allocation2], %s666_s14 }
 0x3ea   : > { %s579_s17 = sshll.u32 %s241_s15, 4  ;;  %s1074_s17 = int_to_ptr.vmem [resolvable:$true] %s579_s17 }
 0x3eb   : > { %s808_s16 = scalar_lea.vmem %s1074_s17, 256  ;;  %p815_p1 = scmp.lt.s32.totalorder %s1074_s17, %s813_s10 }
 0x3ec   : > { %p809_p12 = scmp.ne.s32.totalorder %s1074_s17, %s808_s16  ;;  %p816_p2 = scmp.lt.s32.totalorder %s814_s11, %s808_s16 }
 0x3ee   : > { %p810_p13 = pnand %p809_p12, %p963_p4  ;;  %p817_p3 = por %p816_p2, %p815_p1 }
 0x3f0   : > { %p811_p0 = pneg %p810_p13 }
 0x3f2   : > { %p818_p5 = pnand %p817_p3, %p811_p0 }
 0x458   : > { %v459_v34 = vpop.permute.xlu1 %458 }
 0x459   : > { %v457_v35 = vpop.permute.xlu0 %456 }
 0x45a   : > { %713 = vmatprep.mubr.msk.f32.mxu0 %vm460_vm0, %v457_v35 }
 0x45b   : > { %714 = vmatmul.mubr.msk.f32.vlgmr.msra.gmra.mrb[0].mxu0 %vm460_vm0, %v459_v34 }
 0x52e   : > { %v715_v37 = vpop.f32.mrb[0].mxu0 }
 0x52f   : > { %v548_v38 = vadd.f32 %v715_v37, %v680_v36  ;;  %v531_v39 = vpop.f32.mrb[1].mxu0 }
 0x530   : > { %v547_v40 = vadd.f32 %v680_v36, %v531_v39 }
 0x531   : > { %v550_v41 = vsub.f32 0.0, %v548_v38 }
 0x532   : > { %v549_v42 = vsub.f32 0.0, %v547_v40 }
 0x533   : > { %v553_v43 = vmul.f32 1.442695, %v550_v41 }
 0x534   : > { %v551_v44 = vmul.f32 1.442695, %v549_v42 }
 0x535   : > { %800 = vpow2.f32 %v553_v43 }
 0x536   : > { %802 = vpow2.f32 %v551_v44 }
 0x53f   : > { %v801_v45 = vpop.eup %800 }
 0x540   : > { %v803_v46 = vpop.eup %802  ;;  %v556_v47 = vadd.f32 1.0, %v801_v45 }
 0x541   : > { %v555_v48 = vadd.f32 1.0, %v803_v46 }
 0x542   : > { %804 = vrcp.f32 %v556_v47 }
 0x543   : > { %806 = vrcp.f32 %v555_v48 }
 0x54c   : > { %v805_v49 = vpop.eup %804 }
 0x54d   : > { %v807_v50 = vpop.eup %806  ;;  %v560_v51 = vmul.f32 %v805_v49, %v548_v38 }
 0x54e   : > { %v559_v52 = vmul.f32 %v807_v50, %v547_v40 }
 0x54f   : > { %562 = vst [vmem:[%s241_s15 + $0x8] sm:$0xff] %v560_v51 }
 0x550   : > { %561 = vst [vmem:[%s241_s15] sm:$0xff] %v559_v52 }
 0x551   : > { %821 = shalt.err (!%p818_p5)
}
 0x552   : > { %s822_s12 = scalar_lea.hbm %s1079_s27, 256  ;;  %s826_s14 = scalar_lea.hbm %s1133_s5, 512 }
 0x553   : > { %p823_p6 = scmp.ne.s32.totalorder %s1079_s27, %s822_s12  ;;  %p827_p10 = scmp.lt.u32.totalorder %s1079_s27, %s1133_s5 }
 0x554   : > { %p828_p11 = scmp.lt.u32.totalorder %s826_s14, %s822_s12  ;;  %p830_p13 = scmp.lt.u32.totalorder %s822_s12, %s1079_s27 }
 0x555   : > { %p824_p7 = pnand %p823_p6, %p963_p4 }
 0x556   : > { %p829_p12 = por %p828_p11, %p827_p10 }
 0x557   : > { %p825_p9 = pneg %p824_p7 }
 0x558   : > { %p831_p0 = por %p830_p13, %p829_p12 }
 0x55a   : > { %p832_p1 = pnand %p831_p0, %p825_p9 }
 0x55c   : > { %835 = shalt.err (!%p832_p1)
}
 0x55d   : > { %s892_s9 = smov 128  }
 0x55e   : > { %733 = dma.vmem_to_hbm [thread:$0]  (%p963_p4), %s1074_s17, 256, %s1079_s27, %s1081_s8, %s892_s9, %s892_s9, %s889_s29  }
 0x55f PF: > { %p739_p2 = scmp.ge.s32.totalorder %s886_s23, 2  ;;  %s594_s25 = sand.u32 1, %s866_s18  }
 0x560   : > { %s595_s16 = scalar_lea.sflag [#allocation3], %s594_s25 }
 0x561   : > { %p736_p3 = pnand %p739_p2, %p970_p8 }
 0x563   : > { %861 = dma.done.wait (!%p736_p3), %s595_s16, 256  }
 0x564   : > { %863 = vsyncadd (!%p736_p3), %s595_s16, 4294967040  ;;  %s18_s23 = sadd.s32 1, %s886_s23   ;;  %s1136_s18 = smov %s870_s19 }
 0x565   : > { %p15_p5 = scmp.ge.s32.totalorder %s18_s23, 4   ;;  %s1137_s19 = smov %s874_s20 }
 0x566   : > { %s1138_s20 = smov %s976_s6  ;;  %s1139_s21 = smov %s882_s22 }
 0x567   : > { %s1140_s22 = smov %s1142_s26  ;;  %17 = sbr.rel (!%p15_p5) target bundleno = 4 (0x4), region = 75 }
 0x56e   :  { %600 = vsyncpa [#allocation3], 1 }
 0x56f   :  { %602 = vsyncpa [#allocation3 + $0x1], 1 }

</bundles_post_ra>
